<compile_context>
chip_gen: v7x
topology: tpu7x:2x2x1
jax: 0.10.0
libtpu: 0.0.40
codegen_flags: <defaults>
</compile_context>

<pallas_src>
import math

import jax
import jax.numpy as jnp
import numpy as np
from jax.experimental import pallas as pl
from jax.experimental.pallas import tpu as pltpu

INPUT_SIZE, HIDDEN_SIZE, OUTPUT_SIZE = 10, 20, 2
CONV_OUT, CONV_K = 8, 3
PATCH_H, PATCH_W = 3, 12           # padded rows -1..1, padded cols -1..10
PATCH_F = PATCH_H * PATCH_W        # 36
TB_MAX = 4096                      # batch-tile rows (bf16 patch: ~288 KiB/buffer)


def mlp_kernel(x_ref, w1_ref, b1_ref, w2_ref, b2_ref, out_ref):
    # x_ref: (TB, F) bf16   w1_ref: (F, 20) bf16   b1_ref: (1, 20) f32
    # w2_ref: (20, 2) f32   b2_ref: (1, 2) f32     out_ref: (TB, 2) f32
    h = jnp.dot(x_ref[...], w1_ref[...], preferred_element_type=jnp.float32)
    h = jnp.maximum(h + b1_ref[...], 0.0)
    out_ref[...] = (
        jnp.dot(h, w2_ref[...], preferred_element_type=jnp.float32) + b2_ref[...]
    )


def _round_up(n, m):
    return (n + m - 1) // m * m


def _run_mlp(feats, w1, b1, w2, b2):
    """feats (B, F) f32 -> relu(feats @ w1 + b1) @ w2 + b2, tiled over batch."""
    B, F = feats.shape
    Hd = w1.shape[1]
    O = w2.shape[1]

    tb = min(TB_MAX, _round_up(B, 8))
    Bp = _round_up(B, tb)

    xb = feats.astype(jnp.bfloat16)
    if Bp != B:
        xb = jnp.pad(xb, ((0, Bp - B), (0, 0)))

    out = pl.pallas_call(
        mlp_kernel,
        out_shape=jax.ShapeDtypeStruct((Bp, O), jnp.float32),
        grid_spec=pltpu.PrefetchScalarGridSpec(
            num_scalar_prefetch=0,
            grid=(Bp // tb,),
            in_specs=[
                pl.BlockSpec((tb, F), lambda i: (i, 0)),   # batch-tiled input
                pl.BlockSpec((F, Hd), lambda i: (0, 0)),   # resident weights
                pl.BlockSpec((1, Hd), lambda i: (0, 0)),
                pl.BlockSpec((Hd, O), lambda i: (0, 0)),
                pl.BlockSpec((1, O), lambda i: (0, 0)),
            ],
            out_specs=pl.BlockSpec((tb, O), lambda i: (i, 0)),
        ),
        compiler_params=pltpu.CompilerParams(
            dimension_semantics=("parallel",),       # megacore-shard batch (v7x)
            vmem_limit_bytes=32 * 1024 * 1024,       # explicit for v5e's 16MiB default
        ),
    )(xb, w1.astype(jnp.bfloat16), b1.astype(jnp.float32),
      w2.astype(jnp.float32), b2.astype(jnp.float32))
    return out[:B]


def _conv_channel0_as_matrix(conv_w):
    """(36, 10) matrix so that patch_flat @ Wc == conv ch0, out row 0, cols 0..9."""
    wc33 = conv_w[0, 0].astype(jnp.float32)          # (3, 3)
    cols = []
    for j in range(INPUT_SIZE):                      # output col j uses padded cols j..j+2
        col = jnp.zeros((PATCH_H, PATCH_W), jnp.float32).at[:, j:j + CONV_K].set(wc33)
        cols.append(col.reshape(PATCH_F))
    return jnp.stack(cols, axis=1)                   # (36, 10)


def init_params(seed=1):
    """Deterministic PyTorch-like (uniform +/- 1/sqrt(fan_in)) init."""
    ks = jax.random.split(jax.random.PRNGKey(seed), 6)

    def uni(key, shape, fan_in):
        bound = 1.0 / math.sqrt(fan_in)
        return jax.random.uniform(key, shape, jnp.float32, -bound, bound)

    return {
        "fc1_w": uni(ks[0], (HIDDEN_SIZE, INPUT_SIZE), INPUT_SIZE),            # (20, 10)
        "fc1_b": uni(ks[1], (HIDDEN_SIZE,), INPUT_SIZE),                       # (20,)
        "fc2_w": uni(ks[2], (OUTPUT_SIZE, HIDDEN_SIZE), HIDDEN_SIZE),          # (2, 20)
        "fc2_b": uni(ks[3], (OUTPUT_SIZE,), HIDDEN_SIZE),                      # (2,)
        "conv_w": uni(ks[4], (CONV_OUT, 1, CONV_K, CONV_K), CONV_K * CONV_K),  # (8,1,3,3)
        "conv_b": uni(ks[5], (CONV_OUT,), CONV_K * CONV_K),                    # (8,)
    }


def simple_model_forward(params, x):
    w1t = params["fc1_w"].T                              # (10, 20)
    b1 = params["fc1_b"].reshape(1, HIDDEN_SIZE)         # (1, 20)
    w2t = params["fc2_w"].T                              # (20, 2)
    b2 = params["fc2_b"].reshape(1, OUTPUT_SIZE)         # (1, 2)

    if x.ndim == 4:
        B, C, H, W = x.shape
        assert C == 1, "conv1 expects a single input channel (NCHW, C=1)"
        assert W >= INPUT_SIZE, "flatten()[:, :10] maps to ch0/row0 only if W >= 10"

        # Only the 3x12 zero-padded patch around output row 0 / cols 0..9 matters.
        h_take, w_take = min(2, H), min(11, W)
        core = x[:, 0, :h_take, :w_take].astype(jnp.float32)        # (B, <=2, <=11)
        patch = jnp.pad(core, ((0, 0), (1, 2 - h_take), (1, 11 - w_take)))  # (B, 3, 12)
        feats = patch.reshape(B, PATCH_F)                            # (B, 36)

        # Fold conv ch0 (weights + bias) into fc1: all linear, done once in f32.
        wc_mat = _conv_channel0_as_matrix(params["conv_w"])          # (36, 10)
        w1_eff = wc_mat @ w1t                                        # (36, 20)
        b1_eff = b1 + params["conv_b"][0] * jnp.sum(w1t, axis=0, keepdims=True)
        return _run_mlp(feats, w1_eff, b1_eff, w2t, b2)
    else:
        return _run_mlp(x.astype(jnp.float32), w1t, b1, w2t, b2)


def reference_forward(params, x):
    """Pure-JAX reference mirroring the PyTorch forward."""
    if x.ndim == 4:
        y = jax.lax.conv_general_dilated(
            x, params["conv_w"], window_strides=(1, 1), padding=((1, 1), (1, 1)),
            dimension_numbers=("NCHW", "OIHW", "NCHW"))
        y = y + params["conv_b"][None, :, None, None]
        y = y.reshape(y.shape[0], -1)[:, :INPUT_SIZE]
    else:
        y = x
    h = jnp.maximum(y @ params["fc1_w"].T + params["fc1_b"], 0.0)
    return h @ params["fc2_w"].T + params["fc2_b"]


if __name__ == "__main__":
    params = init_params(seed=1)
    k4, k2 = jax.random.split(jax.random.PRNGKey(0))

    # 4D (conv) branch and 2D (plain MLP) branch, small shapes.
    x4 = jax.random.normal(k4, (2, 1, 16, 16), jnp.float32)
    x2 = jax.random.normal(k2, (2, INPUT_SIZE), jnp.float32)

    out4 = jax.block_until_ready(simple_model_forward(params, x4))
    out2 = jax.block_until_ready(simple_model_forward(params, x2))

    ref4 = np.asarray(reference_forward(params, x4))
    ref2 = np.asarray(reference_forward(params, x2))

    assert out4.shape == (2, OUTPUT_SIZE) and out2.shape == (2, OUTPUT_SIZE)
    assert np.allclose(np.asarray(out4), ref4, rtol=2e-2, atol=2e-2)
    assert np.allclose(np.asarray(out2), ref2, rtol=2e-2, atol=2e-2)
    print("KERNEL_OK")
</pallas_src>

<mosaic_0001>
module attributes {stable_mosaic.version = 11 : i64} {
  func.func @mlp_kernel(%arg0: i32, %arg1: memref<8x36xbf16, #tpu.memory_space<vmem>>, %arg2: memref<36x20xbf16, #tpu.memory_space<vmem>>, %arg3: memref<1x20xf32, #tpu.memory_space<vmem>>, %arg4: memref<20x2xf32, #tpu.memory_space<vmem>>, %arg5: memref<1x2xf32, #tpu.memory_space<vmem>>, %arg6: memref<8x2xf32, #tpu.memory_space<vmem>>) attributes {dimension_semantics = [#tpu.dimension_semantics<parallel>], iteration_bounds = array<i64: 1>, scalar_prefetch = 0 : i64, scratch_operands = 0 : i64, tpu.core_type = #tpu.core_type<tc>, window_params = [{transform_indices = @transform_0, window_bounds = array<i64: 8, 36>}, {pipeline_mode = #tpu.pipeline_mode<synchronous>, transform_indices = @transform_1, window_bounds = array<i64: 36, 20>}, {pipeline_mode = #tpu.pipeline_mode<synchronous>, transform_indices = @transform_2, window_bounds = array<i64: 1, 20>}, {pipeline_mode = #tpu.pipeline_mode<synchronous>, transform_indices = @transform_3, window_bounds = array<i64: 20, 2>}, {pipeline_mode = #tpu.pipeline_mode<synchronous>, transform_indices = @transform_4, window_bounds = array<i64: 1, 2>}, {transform_indices = @transform_5, window_bounds = array<i64: 8, 2>}]} {
    %c0 = arith.constant 0 : index
    %c0_0 = arith.constant 0 : index
    %0 = vector.load %arg1[%c0, %c0_0] : memref<8x36xbf16, #tpu.memory_space<vmem>>, vector<8x36xbf16>
    %c0_1 = arith.constant 0 : index
    %c0_2 = arith.constant 0 : index
    %1 = vector.load %arg2[%c0_1, %c0_2] : memref<36x20xbf16, #tpu.memory_space<vmem>>, vector<36x20xbf16>
    %cst = arith.constant dense<0.000000e+00> : vector<8x20xf32>
    %2 = tpu.matmul %0, %1, %cst {dimension_numbers = #tpu.dot_dimension_numbers<[1], [0], [0], [1], [0, 0, 1, 1], [], []>} : vector<8x36xbf16>, vector<36x20xbf16>, vector<8x20xf32> -> vector<8x20xf32>
    %c0_3 = arith.constant 0 : index
    %c0_4 = arith.constant 0 : index
    %3 = vector.load %arg3[%c0_3, %c0_4] : memref<1x20xf32, #tpu.memory_space<vmem>>, vector<1x20xf32>
    %4 = vector.broadcast %3 : vector<1x20xf32> to vector<8x20xf32>
    %5 = arith.addf %2, %4 : vector<8x20xf32>
    %cst_5 = arith.constant 0.000000e+00 : f32
    %6 = vector.broadcast %cst_5 : f32 to vector<8x20xf32>
    %7 = arith.maximumf %5, %6 : vector<8x20xf32>
    %c0_6 = arith.constant 0 : index
    %c0_7 = arith.constant 0 : index
    %8 = vector.load %arg4[%c0_6, %c0_7] : memref<20x2xf32, #tpu.memory_space<vmem>>, vector<20x2xf32>
    %cst_8 = arith.constant dense<0.000000e+00> : vector<8x2xf32>
    %9 = tpu.matmul %7, %8, %cst_8 {dimension_numbers = #tpu.dot_dimension_numbers<[1], [0], [0], [1], [0, 0, 1, 1], [], []>} : vector<8x20xf32>, vector<20x2xf32>, vector<8x2xf32> -> vector<8x2xf32>
    %c0_9 = arith.constant 0 : index
    %c0_10 = arith.constant 0 : index
    %10 = vector.load %arg5[%c0_9, %c0_10] : memref<1x2xf32, #tpu.memory_space<vmem>>, vector<1x2xf32>
    %11 = vector.broadcast %10 : vector<1x2xf32> to vector<8x2xf32>
    %12 = arith.addf %9, %11 : vector<8x2xf32>
    %c0_11 = arith.constant 0 : index
    %c0_12 = arith.constant 0 : index
    %13 = vector.load %arg6[%c0_11, %c0_12] : memref<8x2xf32, #tpu.memory_space<vmem>>, vector<8x2xf32>
    tpu.vector_store %arg6[%c0_11, %c0_12], %12 {strides = array<i32>} : memref<8x2xf32, #tpu.memory_space<vmem>>, vector<8x2xf32>,
    return
  }
  func.func @transform_0(%arg0: i32) -> (i32, i32) {
    %c0_i32 = arith.constant 0 : i32
    %c0_i32_0 = arith.constant 0 : i32
    return %arg0, %c0_i32 : i32, i32
  }
  func.func @transform_1(%arg0: i32) -> (i32, i32) {
    %c0_i32 = arith.constant 0 : i32
    %c0_i32_0 = arith.constant 0 : i32
    %c0_i32_1 = arith.constant 0 : i32
    return %c0_i32, %c0_i32_0 : i32, i32
  }
  func.func @transform_2(%arg0: i32) -> (i32, i32) {
    %c0_i32 = arith.constant 0 : i32
    %c0_i32_0 = arith.constant 0 : i32
    %c0_i32_1 = arith.constant 0 : i32
    return %c0_i32, %c0_i32_0 : i32, i32
  }
  func.func @transform_3(%arg0: i32) -> (i32, i32) {
    %c0_i32 = arith.constant 0 : i32
    %c0_i32_0 = arith.constant 0 : i32
    %c0_i32_1 = arith.constant 0 : i32
    return %c0_i32, %c0_i32_0 : i32, i32
  }
  func.func @transform_4(%arg0: i32) -> (i32, i32) {
    %c0_i32 = arith.constant 0 : i32
    %c0_i32_0 = arith.constant 0 : i32
    %c0_i32_1 = arith.constant 0 : i32
    return %c0_i32, %c0_i32_0 : i32, i32
  }
  func.func @transform_5(%arg0: i32) -> (i32, i32) {
    %c0_i32 = arith.constant 0 : i32
    %c0_i32_0 = arith.constant 0 : i32
    return %arg0, %c0_i32 : i32, i32
  }
}

</mosaic_0001>

<bundles_post_ra>
// kernel: tpu_custom_call.1
= control target key start
LH: loop header
LB: loop body
LE: loop exit
PB: predicated region body
PF: predicated region fallthrough
CT: control target
= control target key end

     0   :  { %v236_v0 = vmov 0.0   ;;  %vm237_vm0 = vmmov 0   ;;  %v238_v2 = vmov 0.0|0.0   ;;  %vm53_vm1 = vcmask 1041408   ;;  %s299_s1 = inlined_call_operand.vmem [shape: bf16[36,20], index: 1, kind: input, shape index: {}]   ;;  %s300_s0 = inlined_call_operand.vmem [shape: bf16[8,36], index: 0, kind: input, shape index: {}]   ;;  %s301_s3 = inlined_call_operand.vmem [shape: f32[20,2], index: 3, kind: input, shape index: {}]   ;;  %s302_s2 = inlined_call_operand.vmem [shape: f32[1,20], index: 2, kind: input, shape index: {}]   ;;  %s303_s4 = inlined_call_operand.vmem [shape: f32[1,2], index: 4, kind: input, shape index: {}]   ;;  %s304_s5 = inlined_call_operand.vmem [shape: f32[8,2], index: 5, kind: output, shape index: {}]  }
   0x1   :  { %208 = vmatprep.subr.bf16.mxu0 %v236_v0  ;;  %v233_v1 = vld [vmem:[%s299_s1] sm:$0xff]   ;;  %214 = vmatprep.mubr.msk.bf16.mxu0 %vm237_vm0, %v236_v0  ;;  %v234_v3 = vld [vmem:[%s299_s1 + $0x8] sm:$0xff]   ;;  %v235_v4 = vld [vmem:[%s299_s1 + $0x10] ss:$0 sps:$4 sm:$0x33]   ;;  %vm49_vm2 = vcmask 293888  }
   0x2   :  { %227 = vmatprep.subr.bf16.mxu1 %v238_v2  ;;  %224 = vmatprep.mubr.msk.f32.mxu1 %vm237_vm0, %v236_v0  ;;  %v55_v5 = vsel %vm53_vm1, %v235_v4, 0  ;;  %v21_v6 = vld [vmem:[%s300_s0] sm:$0xf]  ;;  %v99_v8 = vld [vmem:[%s301_s3 + $0x8] sm:$0xff]  ;;  %v100_v10 = vld [vmem:[%s301_s3 + $0x10] sm:$0xf] }
   0x3   :  { %209 = vmatpush3.bf16.msra.mxu0 %v233_v1  ;;  %v98_v7 = vld [vmem:[%s301_s3] sm:$0xff]  ;;  %vm112_vm3 = vcmask 1043456   ;;  %vm108_vm4 = vcmask 162816   ;;  %vm186_vm5 = vcmask 15360  }
   0x4   :  { %210 = vmatprep.subr.bf16.mxu0 %v236_v0  ;;  %v228_v9 = vpack.c.bf16 %v99_v8, %v98_v7  ;;  %v192_v11 = vld [vmem:[%s302_s2] ss:$0 sm:$0xff] }
   0x5   :  { %v197_v18 = vld [vmem:[%s303_s4] ss:$0 sm:$0xff] }
   0x6   :  { %229 = vmatpush3.bf16.msra.mxu1 %v228_v9 }
   0x7   :  { %211 = vmatpush3.bf16.msra.mxu0 %v234_v3  ;;  %222 = vmatprep.subr.mxu1 %v236_v0 }
   0x8   :  { %212 = vmatprep.subr.bf16.mxu0 %v236_v0 }
   0xa   :  { %223 = vmatpush3.msk.msra.mxu1 %vm112_vm3, %v100_v10 }
   0xb   :  { %213 = vmatpush3.bf16.msra.mxu0 %v55_v5 }
   0xe   :  { %215 = vmatmul.mubr.msk.bf16.vlgmr.msra.gmra.mrb[0].mxu0 %vm49_vm2, %v21_v6 }
  0xe1   :  { %v91_v12 = vpop.f32.mrb[0].mxu0 }
  0xe2   :  { %v92_v13 = vadd.f32 %v192_v11, %v91_v12  ;;  %v216_v14 = vpop.f32.mrb[1].mxu0 }
  0xe3   :  { %v94_v15 = vpop.f32.mrb[2].mxu0 }
  0xe4   :  { %v97_v16 = vmax.f32 %v92_v13, 0.0  ;;  %v217_v17 = vpop.f32.mrb[3].mxu0 }
  0xe6   :  { %225 = vmatmul.mubr.msk.f32.vlgmr.msra.gmra.mrb[0].mxu1 %vm108_vm4, %v97_v16 }
 0x1b9   :  { %v182_v19 = vpop.f32.mrb[0].mxu1 }
 0x1ba   :  { %v183_v20 = vadd.f32 %v197_v18, %v182_v19  ;;  %v226_v21 = vpop.f32.mrb[1].mxu1 }
 0x1bc   :  { %187 = vst.msk [vmem:[%s304_s5] sm:$0xff] %vm186_vm5, %v183_v20 }

</bundles_post_ra>
